<compile_context>
chip_gen: v7x
topology: tpu7x:2x2x1
jax: 0.10.0
libtpu: 0.0.40
codegen_flags: <defaults>
</compile_context>

<pallas_src>
import jax
import jax.numpy as jnp
from jax.experimental import pallas as pl
from jax.experimental.pallas import tpu as pltpu

NEG_SLOPE = 0.01  # torch.nn.functional.leaky_relu default


def _round_up(n, m):
    return ((n + m - 1) // m) * m


def _leaky_relu_f32(h):
    # max(h, 0.01*h) == leaky_relu for 0 < slope < 1; one VPU op.
    return jnp.maximum(h, NEG_SLOPE * h)


def dqn_kernel(x_ref,
               w1_ref, b1_ref,
               w2_ref, b2_ref,
               w3_ref, b3_ref,
               w4_ref, b4_ref,
               o_ref):
    # f32 tile from HBM, cast to bf16 in-kernel (free on the VPU slack).
    x = x_ref[...].astype(jnp.bfloat16)

    # Each layer: bf16 matmul -> f32 MXU accumulate -> f32 bias + leaky_relu
    # -> downcast to bf16 only for the next matmul's input.
    h = jnp.dot(x, w1_ref[...], preferred_element_type=jnp.float32) + b1_ref[...]
    h = _leaky_relu_f32(h).astype(jnp.bfloat16)

    h = jnp.dot(h, w2_ref[...], preferred_element_type=jnp.float32) + b2_ref[...]
    h = _leaky_relu_f32(h).astype(jnp.bfloat16)

    h = jnp.dot(h, w3_ref[...], preferred_element_type=jnp.float32) + b3_ref[...]
    h = _leaky_relu_f32(h).astype(jnp.bfloat16)

    out = jnp.dot(h, w4_ref[...], preferred_element_type=jnp.float32) + b4_ref[...]
    # Lane-dense 128-wide bf16 store (unmasked vst).
    o_ref[...] = out.astype(o_ref.dtype)


def prepare_dqn_params(params):
    """One-time, cacheable kernel-ready parameter prep (bf16 weights, padded head)."""
    num_actions = params["w4"].shape[1]
    head_pad = _round_up(max(num_actions, 1), 128)  # lane-dense output width
    prepped = {
        "w1": params["w1"].astype(jnp.bfloat16),
        "b1": params["b1"].astype(jnp.float32),
        "w2": params["w2"].astype(jnp.bfloat16),
        "b2": params["b2"].astype(jnp.float32),
        "w3": params["w3"].astype(jnp.bfloat16),
        "b3": params["b3"].astype(jnp.float32),
        "w4": jnp.pad(params["w4"],
                      ((0, 0), (0, head_pad - num_actions))).astype(jnp.bfloat16),
        "b4": jnp.pad(params["b4"],
                      ((0, 0), (0, head_pad - num_actions))).astype(jnp.float32),
        "num_actions": num_actions,
        "head_pad": head_pad,
    }
    return prepped


def dqn_forward(x, prepped, *, block_b=1024):
    """x: [B, input_size] float32. prepped: output of prepare_dqn_params."""
    B, in_size = x.shape
    num_actions = prepped["num_actions"]
    head_pad = prepped["head_pad"]

    # Balanced batch tiles (multiple of 8), >=2 grid steps when possible so the
    # "parallel" axis can shard across v7x's two TensorCores.
    b8 = _round_up(max(B, 1), 8)
    n_tiles = max(-(-b8 // block_b), 2 if b8 >= 16 else 1)
    tb = _round_up(-(-b8 // n_tiles), 8)
    b_pad = tb * n_tiles
    if b_pad != B:
        x = jnp.pad(x, ((0, b_pad - B), (0, 0)))  # <=7 rows/tile of padding

    w1, b1 = prepped["w1"], prepped["b1"]
    w2, b2 = prepped["w2"], prepped["b2"]
    w3, b3 = prepped["w3"], prepped["b3"]
    w4, b4 = prepped["w4"], prepped["b4"]

    def resident(arr):
        # Whole array as one block, same block every grid step -> VMEM-resident.
        return pl.BlockSpec(arr.shape, lambda i: (0, 0))

    in_specs = [
        pl.BlockSpec((tb, in_size), lambda i: (i, 0)),   # f32 x tile (pipelined)
        resident(w1), resident(b1),
        resident(w2), resident(b2),
        resident(w3), resident(b3),
        resident(w4), resident(b4),
    ]
    out_specs = pl.BlockSpec((tb, head_pad), lambda i: (i, 0))

    flops = 2 * b_pad * (in_size * 64 + 64 * 128 + 128 * 64 + 64 * head_pad)
    bytes_accessed = (
        b_pad * in_size * 4                 # f32 input
        + b_pad * head_pad * 2              # bf16 output
        + sum(a.size * 2 for a in (w1, w2, w3, w4))
        + sum(a.size * 4 for a in (b1, b2, b3, b4)))

    out = pl.pallas_call(
        dqn_kernel,
        out_shape=jax.ShapeDtypeStruct((b_pad, head_pad), jnp.bfloat16),
        grid_spec=pltpu.PrefetchScalarGridSpec(
            num_scalar_prefetch=0,
            grid=(n_tiles,),
            in_specs=in_specs,
            out_specs=out_specs,
        ),
        compiler_params=pltpu.CompilerParams(
            dimension_semantics=("parallel",)),
        cost_estimate=pl.CostEstimate(
            flops=flops, transcendentals=0, bytes_accessed=bytes_accessed),
    )(x, w1, b1, w2, b2, w3, b3, w4, b4)

    return out[:B, :num_actions].astype(jnp.float32)


def init_dqn_params(key, input_size, num_actions):
    """Deterministic init (uniform like PyTorch's default), weights stored (in, out)."""
    sizes = [(input_size, 64), (64, 128), (128, 64), (64, num_actions)]
    params = {}
    for i, (fin, fout) in enumerate(sizes, start=1):
        key, kw, kb = jax.random.split(key, 3)
        bound = 1.0 / (fin ** 0.5)
        params[f"w{i}"] = jax.random.uniform(
            kw, (fin, fout), jnp.float32, minval=-bound, maxval=bound)
        params[f"b{i}"] = jax.random.uniform(
            kb, (1, fout), jnp.float32, minval=-bound, maxval=bound)
    return params


def dqn_reference(x, params):
    """Pure-JAX reference mirroring the kernel's bf16-input / f32-accumulate math."""
    def layer(h, w, b, act):
        h = jnp.dot(h.astype(jnp.bfloat16), w.astype(jnp.bfloat16),
                    preferred_element_type=jnp.float32) + b
        return _leaky_relu_f32(h) if act else h
    h = layer(x, params["w1"], params["b1"], True)
    h = layer(h, params["w2"], params["b2"], True)
    h = layer(h, params["w3"], params["b3"], True)
    return layer(h, params["w4"], params["b4"], False)


if __name__ == "__main__":
    key = jax.random.PRNGKey(0)
    key, kx, kp, kx2 = jax.random.split(key, 4)

    input_size = 8
    num_actions = 4
    params = init_dqn_params(kp, input_size, num_actions)
    prepped = prepare_dqn_params(params)  # one-time, cached across forwards

    # Small case (single grid step, padded batch tile).
    batch = 2
    x = jax.random.normal(kx, (batch, input_size), jnp.float32)
    out = jax.block_until_ready(dqn_forward(x, prepped))
    ref = dqn_reference(x, params)
    assert out.shape == (batch, num_actions)
    # bf16 output + bf16 matmul inputs -> ~1e-2 level agreement with f32 math.
    assert jnp.allclose(out, ref, atol=3e-2, rtol=3e-2), "mismatch vs reference (small)"

    # Multi-step grid case (balanced tiles: 300 -> 2 x 152 rows, 4 pad rows).
    batch2 = 300
    x2 = jax.random.normal(kx2, (batch2, input_size), jnp.float32)
    out2 = jax.block_until_ready(dqn_forward(x2, prepped, block_b=1024))
    ref2 = dqn_reference(x2, params)
    assert out2.shape == (batch2, num_actions)
    assert jnp.allclose(out2, ref2, atol=3e-2, rtol=3e-2), "mismatch vs reference (tiled)"

    print("KERNEL_OK")
</pallas_src>

<mosaic_0001>
module attributes {stable_mosaic.version = 11 : i64} {
  func.func @dqn_kernel(%arg0: i32, %arg1: memref<8x8xf32, #tpu.memory_space<vmem>>, %arg2: memref<8x64xbf16, #tpu.memory_space<vmem>>, %arg3: memref<1x64xf32, #tpu.memory_space<vmem>>, %arg4: memref<64x128xbf16, #tpu.memory_space<vmem>>, %arg5: memref<1x128xf32, #tpu.memory_space<vmem>>, %arg6: memref<128x64xbf16, #tpu.memory_space<vmem>>, %arg7: memref<1x64xf32, #tpu.memory_space<vmem>>, %arg8: memref<64x128xbf16, #tpu.memory_space<vmem>>, %arg9: memref<1x128xf32, #tpu.memory_space<vmem>>, %arg10: memref<8x128xbf16, #tpu.memory_space<vmem>>) attributes {dimension_semantics = [#tpu.dimension_semantics<parallel>], iteration_bounds = array<i64: 1>, scalar_prefetch = 0 : i64, scratch_operands = 0 : i64, tpu.core_type = #tpu.core_type<tc>, window_params = [{transform_indices = @transform_0, window_bounds = array<i64: 8, 8>}, {pipeline_mode = #tpu.pipeline_mode<synchronous>, transform_indices = @transform_1, window_bounds = array<i64: 8, 64>}, {pipeline_mode = #tpu.pipeline_mode<synchronous>, transform_indices = @transform_2, window_bounds = array<i64: 1, 64>}, {pipeline_mode = #tpu.pipeline_mode<synchronous>, transform_indices = @transform_3, window_bounds = array<i64: 64, 128>}, {pipeline_mode = #tpu.pipeline_mode<synchronous>, transform_indices = @transform_4, window_bounds = array<i64: 1, 128>}, {pipeline_mode = #tpu.pipeline_mode<synchronous>, transform_indices = @transform_5, window_bounds = array<i64: 128, 64>}, {pipeline_mode = #tpu.pipeline_mode<synchronous>, transform_indices = @transform_6, window_bounds = array<i64: 1, 64>}, {pipeline_mode = #tpu.pipeline_mode<synchronous>, transform_indices = @transform_7, window_bounds = array<i64: 64, 128>}, {pipeline_mode = #tpu.pipeline_mode<synchronous>, transform_indices = @transform_8, window_bounds = array<i64: 1, 128>}, {transform_indices = @transform_9, window_bounds = array<i64: 8, 128>}]} {
    %c0 = arith.constant 0 : index
    %c0_0 = arith.constant 0 : index
    %0 = vector.load %arg1[%c0, %c0_0] : memref<8x8xf32, #tpu.memory_space<vmem>>, vector<8x8xf32>
    %1 = arith.truncf %0 : vector<8x8xf32> to vector<8x8xbf16>
    %c0_1 = arith.constant 0 : index
    %c0_2 = arith.constant 0 : index
    %2 = vector.load %arg2[%c0_1, %c0_2] : memref<8x64xbf16, #tpu.memory_space<vmem>>, vector<8x64xbf16>
    %cst = arith.constant dense<0.000000e+00> : vector<8x64xf32>
    %3 = tpu.matmul %1, %2, %cst {dimension_numbers = #tpu.dot_dimension_numbers<[1], [0], [0], [1], [0, 0, 1, 1], [], []>} : vector<8x8xbf16>, vector<8x64xbf16>, vector<8x64xf32> -> vector<8x64xf32>
    %c0_3 = arith.constant 0 : index
    %c0_4 = arith.constant 0 : index
    %4 = vector.load %arg3[%c0_3, %c0_4] : memref<1x64xf32, #tpu.memory_space<vmem>>, vector<1x64xf32>
    %5 = vector.broadcast %4 : vector<1x64xf32> to vector<8x64xf32>
    %6 = arith.addf %3, %5 : vector<8x64xf32>
    %cst_5 = arith.constant 0.00999999977 : f32
    %7 = vector.broadcast %cst_5 : f32 to vector<8x64xf32>
    %8 = arith.mulf %7, %6 : vector<8x64xf32>
    %9 = arith.maximumf %6, %8 : vector<8x64xf32>
    %10 = arith.truncf %9 : vector<8x64xf32> to vector<8x64xbf16>
    %c0_6 = arith.constant 0 : index
    %c0_7 = arith.constant 0 : index
    %11 = vector.load %arg4[%c0_6, %c0_7] : memref<64x128xbf16, #tpu.memory_space<vmem>>, vector<64x128xbf16>
    %cst_8 = arith.constant dense<0.000000e+00> : vector<8x128xf32>
    %12 = tpu.matmul %10, %11, %cst_8 {dimension_numbers = #tpu.dot_dimension_numbers<[1], [0], [0], [1], [0, 0, 1, 1], [], []>} : vector<8x64xbf16>, vector<64x128xbf16>, vector<8x128xf32> -> vector<8x128xf32>
    %c0_9 = arith.constant 0 : index
    %c0_10 = arith.constant 0 : index
    %13 = vector.load %arg5[%c0_9, %c0_10] : memref<1x128xf32, #tpu.memory_space<vmem>>, vector<1x128xf32>
    %14 = vector.broadcast %13 : vector<1x128xf32> to vector<8x128xf32>
    %15 = arith.addf %12, %14 : vector<8x128xf32>
    %cst_11 = arith.constant 0.00999999977 : f32
    %16 = vector.broadcast %cst_11 : f32 to vector<8x128xf32>
    %17 = arith.mulf %16, %15 : vector<8x128xf32>
    %18 = arith.maximumf %15, %17 : vector<8x128xf32>
    %19 = arith.truncf %18 : vector<8x128xf32> to vector<8x128xbf16>
    %c0_12 = arith.constant 0 : index
    %c0_13 = arith.constant 0 : index
    %20 = vector.load %arg6[%c0_12, %c0_13] : memref<128x64xbf16, #tpu.memory_space<vmem>>, vector<128x64xbf16>
    %cst_14 = arith.constant dense<0.000000e+00> : vector<8x64xf32>
    %21 = tpu.matmul %19, %20, %cst_14 {dimension_numbers = #tpu.dot_dimension_numbers<[1], [0], [0], [1], [0, 0, 1, 1], [], []>} : vector<8x128xbf16>, vector<128x64xbf16>, vector<8x64xf32> -> vector<8x64xf32>
    %c0_15 = arith.constant 0 : index
    %c0_16 = arith.constant 0 : index
    %22 = vector.load %arg7[%c0_15, %c0_16] : memref<1x64xf32, #tpu.memory_space<vmem>>, vector<1x64xf32>
    %23 = vector.broadcast %22 : vector<1x64xf32> to vector<8x64xf32>
    %24 = arith.addf %21, %23 : vector<8x64xf32>
    %cst_17 = arith.constant 0.00999999977 : f32
    %25 = vector.broadcast %cst_17 : f32 to vector<8x64xf32>
    %26 = arith.mulf %25, %24 : vector<8x64xf32>
    %27 = arith.maximumf %24, %26 : vector<8x64xf32>
    %28 = arith.truncf %27 : vector<8x64xf32> to vector<8x64xbf16>
    %c0_18 = arith.constant 0 : index
    %c0_19 = arith.constant 0 : index
    %29 = vector.load %arg8[%c0_18, %c0_19] : memref<64x128xbf16, #tpu.memory_space<vmem>>, vector<64x128xbf16>
    %cst_20 = arith.constant dense<0.000000e+00> : vector<8x128xf32>
    %30 = tpu.matmul %28, %29, %cst_20 {dimension_numbers = #tpu.dot_dimension_numbers<[1], [0], [0], [1], [0, 0, 1, 1], [], []>} : vector<8x64xbf16>, vector<64x128xbf16>, vector<8x128xf32> -> vector<8x128xf32>
    %c0_21 = arith.constant 0 : index
    %c0_22 = arith.constant 0 : index
    %31 = vector.load %arg9[%c0_21, %c0_22] : memref<1x128xf32, #tpu.memory_space<vmem>>, vector<1x128xf32>
    %32 = vector.broadcast %31 : vector<1x128xf32> to vector<8x128xf32>
    %33 = arith.addf %30, %32 : vector<8x128xf32>
    %34 = arith.truncf %33 : vector<8x128xf32> to vector<8x128xbf16>
    %c0_23 = arith.constant 0 : index
    %c0_24 = arith.constant 0 : index
    %35 = vector.load %arg10[%c0_23, %c0_24] : memref<8x128xbf16, #tpu.memory_space<vmem>>, vector<8x128xbf16>
    tpu.vector_store %arg10[%c0_23, %c0_24], %34 {strides = array<i32>} : memref<8x128xbf16, #tpu.memory_space<vmem>>, vector<8x128xbf16>,
    return
  }
  func.func @transform_0(%arg0: i32) -> (i32, i32) {
    %c0_i32 = arith.constant 0 : i32
    %c0_i32_0 = arith.constant 0 : i32
    return %arg0, %c0_i32 : i32, i32
  }
  func.func @transform_1(%arg0: i32) -> (i32, i32) {
    %c0_i32 = arith.constant 0 : i32
    %c0_i32_0 = arith.constant 0 : i32
    %c0_i32_1 = arith.constant 0 : i32
    return %c0_i32, %c0_i32_0 : i32, i32
  }
  func.func @transform_2(%arg0: i32) -> (i32, i32) {
    %c0_i32 = arith.constant 0 : i32
    %c0_i32_0 = arith.constant 0 : i32
    %c0_i32_1 = arith.constant 0 : i32
    return %c0_i32, %c0_i32_0 : i32, i32
  }
  func.func @transform_3(%arg0: i32) -> (i32, i32) {
    %c0_i32 = arith.constant 0 : i32
    %c0_i32_0 = arith.constant 0 : i32
    %c0_i32_1 = arith.constant 0 : i32
    return %c0_i32, %c0_i32_0 : i32, i32
  }
  func.func @transform_4(%arg0: i32) -> (i32, i32) {
    %c0_i32 = arith.constant 0 : i32
    %c0_i32_0 = arith.constant 0 : i32
    %c0_i32_1 = arith.constant 0 : i32
    return %c0_i32, %c0_i32_0 : i32, i32
  }
  func.func @transform_5(%arg0: i32) -> (i32, i32) {
    %c0_i32 = arith.constant 0 : i32
    %c0_i32_0 = arith.constant 0 : i32
    %c0_i32_1 = arith.constant 0 : i32
    return %c0_i32, %c0_i32_0 : i32, i32
  }
  func.func @transform_6(%arg0: i32) -> (i32, i32) {
    %c0_i32 = arith.constant 0 : i32
    %c0_i32_0 = arith.constant 0 : i32
    %c0_i32_1 = arith.constant 0 : i32
    return %c0_i32, %c0_i32_0 : i32, i32
  }
  func.func @transform_7(%arg0: i32) -> (i32, i32) {
    %c0_i32 = arith.constant 0 : i32
    %c0_i32_0 = arith.constant 0 : i32
    %c0_i32_1 = arith.constant 0 : i32
    return %c0_i32, %c0_i32_0 : i32, i32
  }
  func.func @transform_8(%arg0: i32) -> (i32, i32) {
    %c0_i32 = arith.constant 0 : i32
    %c0_i32_0 = arith.constant 0 : i32
    %c0_i32_1 = arith.constant 0 : i32
    return %c0_i32, %c0_i32_0 : i32, i32
  }
  func.func @transform_9(%arg0: i32) -> (i32, i32) {
    %c0_i32 = arith.constant 0 : i32
    %c0_i32_0 = arith.constant 0 : i32
    return %arg0, %c0_i32 : i32, i32
  }
}

</mosaic_0001>

<bundles_post_ra>
// kernel: tpu_custom_call.1
= control target key start
LH: loop header
LB: loop body
LE: loop exit
PB: predicated region body
PF: predicated region fallthrough
CT: control target
= control target key end

     0   :  { %vm48_vm0 = vcmask 1043456   ;;  %v530_v2 = vmov 0.0   ;;  %vm531_vm1 = vmmov 0   ;;  %vm44_vm2 = vcmask 64512   ;;  %s688_s0 = inlined_call_operand.vmem [shape: f32[8,8], index: 0, kind: input, shape index: {}]   ;;  %s689_s1 = inlined_call_operand.vmem [shape: bf16[8,64], index: 1, kind: input, shape index: {}]   ;;  %s690_s2 = inlined_call_operand.vmem [shape: f32[1,64], index: 2, kind: input, shape index: {}]   ;;  %s691_s3 = inlined_call_operand.vmem [shape: bf16[64,128], index: 3, kind: input, shape index: {}]   ;;  %s692_s4 = inlined_call_operand.vmem [shape: f32[1,128], index: 4, kind: input, shape index: {}]   ;;  %s693_s5 = inlined_call_operand.vmem [shape: bf16[128,64], index: 5, kind: input, shape index: {}]   ;;  %s694_s6 = inlined_call_operand.vmem [shape: f32[1,64], index: 6, kind: input, shape index: {}]   ;;  %s695_s7 = inlined_call_operand.vmem [shape: bf16[64,128], index: 7, kind: input, shape index: {}]   ;;  %s696_s8 = inlined_call_operand.vmem [shape: f32[1,128], index: 8, kind: input, shape index: {}]   ;;  %s697_s9 = inlined_call_operand.hbm [shape: bf16[8,128], index: 9, kind: output, shape index: {}]  }
   0x1   :  { %v36_v0 = vld [vmem:[%s689_s1] sm:$0xf]  ;;  %437 = vmatprep.subr.bf16.mxu0 %v530_v2  ;;  %439 = vmatprep.mubr.msk.bf16.mxu0 %vm531_vm1, %v530_v2  ;;  %v491_v6 = vld [vmem:[%s691_s3 + $0x8] sm:$0xff]  }
   0x2   :  { %v34_v1 = vld [vmem:[%s688_s0] sm:$0xff]  ;;  %v50_v3 = vsel %vm48_vm0, %v36_v0, 0  ;;  %443 = vmatprep.subr.bf16.mxu1 %v530_v2  ;;  %451 = vmatprep.mubr.msk.bf16.mxu1 %vm531_vm1, %v530_v2 }
   0x3   :  { %v35_v4 = vpack.c.bf16 %v34_v1, %v34_v1  ;;  %438 = vmatpush3.bf16.msra.mxu0 %v50_v3  ;;  %v490_v5 = vld [vmem:[%s691_s3] sm:$0xff]  }
   0x4   :  { %455 = vmatprep.subr.bf16.mxu0 %v530_v2  ;;  %444 = vmatpush3.bf16.msra.mxu1 %v490_v5 }
   0x5   :  { %445 = vmatprep.subr.bf16.mxu1 %v530_v2 }
   0x6   :  { %440 = vmatmul.mubr.msk.bf16.vlgmr.msra.gmra.mrb[0].mxu0 %vm44_vm2, %v35_v4 }
   0x7   :  { %471 = vmatprep.mubr.msk.bf16.mxu0 %vm531_vm1, %v530_v2 }
   0x8   :  { %446 = vmatpush3.bf16.msra.mxu1 %v491_v6 }
   0x9   :  { %447 = vmatprep.subr.bf16.mxu1 %v530_v2 }
   0xa   :  { %14 = vsyncpa [#allocation3], 0  ;;  %v492_v7 = vld [vmem:[%s691_s3 + $0x10] sm:$0xff]   ;;  %v493_v8 = vld [vmem:[%s691_s3 + $0x18] sm:$0xff]   ;;  %vm134_vm3 = vcmask 523264  }
   0xb   :  { %v494_v9 = vld [vmem:[%s693_s5] sm:$0xff]   ;;  %v495_v10 = vld [vmem:[%s693_s5 + $0x8] sm:$0xff]   ;;  %v496_v11 = vld [vmem:[%s693_s5 + $0x10] sm:$0xff]  }
   0xc   :  { %448 = vmatpush3.bf16.msra.mxu1 %v492_v7  ;;  %456 = vmatpush3.bf16.msra.mxu0 %v494_v9  ;;  %v497_v12 = vld [vmem:[%s693_s5 + $0x18] sm:$0xff]   ;;  %v498_v13 = vld [vmem:[%s693_s5 + $0x20] sm:$0xff]   ;;  %v499_v14 = vld [vmem:[%s693_s5 + $0x28] sm:$0xff]  }
   0xd   :  { %449 = vmatprep.subr.bf16.mxu1 %v530_v2  ;;  %457 = vmatprep.subr.bf16.mxu0 %v530_v2  ;;  %v393_v15 = vld [vmem:[%s690_s2] ss:$0 sm:$0xff]  ;;  %v500_v24 = vld [vmem:[%s693_s5 + $0x30] sm:$0xff]   ;;  %v501_v25 = vld [vmem:[%s693_s5 + $0x38] sm:$0xff]  }
   0xe   :  { %v502_v26 = vld [vmem:[%s695_s7] sm:$0xff]   ;;  %v503_v27 = vld [vmem:[%s695_s7 + $0x8] sm:$0xff]   ;;  %v504_v37 = vld [vmem:[%s695_s7 + $0x10] sm:$0xff]  }
   0xf   :  { %v395_v28 = vld [vmem:[%s692_s4] ss:$0 sm:$0xff]  ;;  %v505_v38 = vld [vmem:[%s695_s7 + $0x18] sm:$0xff]   ;;  %s532_s7 = smov [#allocation2]  }
  0x10   :  { %450 = vmatpush3.bf16.msra.mxu1 %v493_v8  ;;  %458 = vmatpush3.bf16.msra.mxu0 %v495_v10  ;;  %v401_v39 = vld [vmem:[%s694_s6] ss:$0 sm:$0xff]  ;;  %s385_s24 = sshll.u32 %s532_s7, 4  ;;  %s386_s24 = int_to_ptr.vmem [resolvable:$true] %s385_s24 }
  0x11   :  { %475 = vmatprep.subr.bf16.mxu1 %v530_v2  ;;  %459 = vmatprep.subr.bf16.mxu0 %v530_v2  ;;  %v410_v48 = vld [vmem:[%s696_s8] ss:$0 sm:$0xff]  ;;  %s506_s6 = scalar_lea.vmem %s386_s24, 64  ;;  %p511_p1 = scmp.lt.s32.totalorder %s386_s24, %s386_s24 }
  0x12   :  { %p507_p0 = scmp.ne.s32.totalorder %s386_s24, %s506_s6  ;;  %p512_p2 = scmp.lt.s32.totalorder %s506_s6, %s506_s6 }
  0x14   :  { %460 = vmatpush3.bf16.msra.mxu0 %v496_v11  ;;  %p513_p3 = por %p512_p2, %p511_p1 }
  0x15   :  { %461 = vmatprep.subr.bf16.mxu0 %v530_v2 }
  0x16   :  { %p514_p4 = pnand %p513_p3, %p507_p0 }
  0x18   :  { %462 = vmatpush3.bf16.msra.mxu0 %v497_v12 }
  0x19   :  { %463 = vmatprep.subr.bf16.mxu0 %v530_v2 }
  0x1c   :  { %464 = vmatpush3.bf16.msra.mxu0 %v498_v13 }
  0x1d   :  { %465 = vmatprep.subr.bf16.mxu0 %v530_v2 }
  0x20   :  { %466 = vmatpush3.bf16.msra.mxu0 %v499_v14 }
  0x21   :  { %467 = vmatprep.subr.bf16.mxu0 %v530_v2 }
  0x24   :  { %468 = vmatpush3.bf16.msra.mxu0 %v500_v24 }
  0x25   :  { %469 = vmatprep.subr.bf16.mxu0 %v530_v2 }
  0x28   :  { %470 = vmatpush3.bf16.msra.mxu0 %v501_v25 }
  0xd9   :  { %v86_v16 = vpop.f32.mrb[0].mxu0 }
  0xda   :  { %v87_v17 = vadd.f32 %v393_v15, %v86_v16  ;;  %v441_v18 = vpop.f32.mrb[1].mxu0 }
  0xdb   :  { %v89_v19 = vpop.f32.mrb[2].mxu0 }
  0xdc   :  { %v92_v20 = vmul.f32 0.01, %v87_v17  ;;  %v442_v21 = vpop.f32.mrb[3].mxu0 }
  0xde   :  { %v93_v22 = vmax.f32 %v87_v17, %v92_v20 }
  0xe0   :  { %v94_v23 = vpack.c.bf16 %v93_v22, %v93_v22 }
  0xe2   :  { %452 = vmatmul.mubr.msk.bf16.vlgmr.msra.gmra.mrb[0].mxu1 %vm134_vm3, %v94_v23 }
  0xe3   :  { %483 = vmatprep.mubr.msk.bf16.mxu1 %vm531_vm1, %v530_v2  ;;  %476 = vmatpush3.bf16.msra.mxu1 %v502_v26 }
  0xe4   :  { %477 = vmatprep.subr.bf16.mxu1 %v530_v2 }
  0xe7   :  { %478 = vmatpush3.bf16.msra.mxu1 %v503_v27 }
  0xe8   :  { %479 = vmatprep.subr.bf16.mxu1 %v530_v2 }
  0xeb   :  { %480 = vmatpush3.bf16.msra.mxu1 %v504_v37 }
  0xec   :  { %481 = vmatprep.subr.bf16.mxu1 %v530_v2 }
  0xef   :  { %482 = vmatpush3.bf16.msra.mxu1 %v505_v38 }
 0x1b5   :  { %v172_v29 = vpop.f32.mrb[0].mxu1 }
 0x1b6   :  { %v173_v30 = vadd.f32 %v395_v28, %v172_v29  ;;  %v453_v31 = vpop.f32.mrb[1].mxu1 }
 0x1b7   :  { %v175_v32 = vpop.f32.mrb[2].mxu1 }
 0x1b8   :  { %v178_v33 = vmul.f32 0.01, %v173_v30  ;;  %v454_v34 = vpop.f32.mrb[3].mxu1 }
 0x1ba   :  { %v179_v35 = vmax.f32 %v173_v30, %v178_v33 }
 0x1bc   :  { %v180_v36 = vpack.c.bf16 %v179_v35, %v179_v35 }
 0x1be   :  { %472 = vmatmul.mubr.bf16.vlgmr.msra.gmra.mrb[4].mxu0 %v180_v36 }
 0x291   :  { %v286_v40 = vpop.f32.mrb[4].mxu0 }
 0x292   :  { %v287_v41 = vadd.f32 %v401_v39, %v286_v40  ;;  %v473_v42 = vpop.f32.mrb[5].mxu0 }
 0x293   :  { %v289_v43 = vpop.f32.mrb[6].mxu0 }
 0x294   :  { %v292_v44 = vmul.f32 0.01, %v287_v41  ;;  %v474_v45 = vpop.f32.mrb[7].mxu0 }
 0x296   :  { %v293_v46 = vmax.f32 %v287_v41, %v292_v44 }
 0x298   :  { %v294_v47 = vpack.c.bf16 %v293_v46, %v293_v46 }
 0x29a   :  { %484 = vmatmul.mubr.msk.bf16.vlgmr.msra.gmra.mrb[4].mxu1 %vm134_vm3, %v294_v47 }
 0x36d   :  { %v371_v49 = vpop.f32.mrb[4].mxu1 }
 0x36e   :  { %v372_v50 = vadd.f32 %v410_v48, %v371_v49  ;;  %v485_v51 = vpop.f32.mrb[5].mxu1 }
 0x36f   :  { %v374_v52 = vpop.f32.mrb[6].mxu1 }
 0x370   :  { %v377_v53 = vpack.c.bf16 %v372_v50, %v372_v50  ;;  %v486_v54 = vpop.f32.mrb[7].mxu1 }
 0x372   :  { %378 = vst [vmem:[#allocation2] sm:$0xf] %v377_v53 }
 0x373   :  { %517 = shalt.err (!%p514_p4)
}
 0x374   :  { %s518_s8 = scalar_lea.hbm %s697_s9, 64 }
 0x375   :  { %p519_p5 = scmp.ne.s32.totalorder %s697_s9, %s518_s8  ;;  %p522_p6 = scmp.lt.u32.totalorder %s518_s8, %s697_s9 }
 0x377   :  { %p524_p7 = pnand %p522_p6, %p519_p5 }
 0x379   :  { %527 = shalt.err (!%p524_p7)
}
 0x37a   :  { %388 = dma.vmem_to_hbm [thread:$0]  %s386_s24, 64, %s697_s9, [#allocation3]  }
 0x37b   :  { %528 = dma.done.wait [#allocation3], 64  }
 0x37c   :  { %529 = vsyncadd [#allocation3], 4294967232 }
 0x37d   :  { %392 = vsyncpa [#allocation3], 1 }

</bundles_post_ra>
